<compile_context>
chip_gen: v5e
topology: v5e:2x2
jax: 0.10.0
libtpu: 0.0.40
codegen_flags: <defaults>
</compile_context>

<pallas_src>
from collections import namedtuple
from functools import partial

import jax
import jax.numpy as jnp
from jax import lax
from jax.experimental import pallas as pl
from jax.experimental.pallas import tpu as pltpu

InputData = namedtuple(
    "InputData",
    [
        "input_ids", "labels", "attention_mask", "encoder_hidden_states",
        "encoder_attention_mask", "inputs_embeds", "head_mask",
        "cross_attn_head_mask", "past_key_values", "use_cache",
        "output_attentions", "output_hidden_states", "return_dict",
        "hidden_states", "encoder_extended_attention_mask", "position_bias",
        "encoder_decoder_position_bias", "decoder_input_ids",
        "decoder_inputs_embeds", "lm_logits", "loss",
        "extended_attention_mask", "decoder_attention_mask",
        "decoder_head_mask", "input_shape",
    ],
)


class Config:
    decoder_start_token_id = 0
    pad_token_id = 0


# ----------------------------------------------------------------------------
# Pallas kernel: shift-right along the sequence (last / lane) axis.
#   out[:, 0]  = decoder_start_token_id
#   out[:, 1:] = labels[:, :-1]
# roll -> XLU, masked select -> VPU; vld/vst + HBM DMA are the binding slots.
# ----------------------------------------------------------------------------
def _shift_right_kernel(labels_ref, out_ref, *, start_token):
    x = labels_ref[...]                                    # [TB, S] int
    # pltpu.roll needs a non-negative axis index.
    rolled = pltpu.roll(x, shift=1, axis=x.ndim - 1)       # out[:, j] = x[:, j-1]
    col = lax.broadcasted_iota(jnp.int32, x.shape, dimension=x.ndim - 1)
    out_ref[...] = jnp.where(col == 0,
                             jnp.asarray(start_token, dtype=x.dtype),
                             rolled)


def shift_right_pallas(labels, decoder_start_token_id, *, block_batch=None):
    """Pallas shift-right. labels: [B, S] integer array (S should be 128-aligned)."""
    b, s = labels.shape
    itemsize = labels.dtype.itemsize
    bytes_per_row = s * itemsize
    total_bytes = b * bytes_per_row

    if block_batch is None:
        # 2 MiB blocks: (1 in + 1 out) x 2 double-buffers = 8 MiB, safe under
        # the v5e 16 MiB scoped-VMEM default (and under v6e/v7x budgets),
        # while still ~85% of HBM roofline.
        target_block_bytes = 2 * 1024 * 1024
        tb = max(8, target_block_bytes // max(bytes_per_row, 1))
        tb = min(tb, b)
        if tb != b:
            # second-to-last block dim must be a multiple of 8 (or full extent)
            tb = max(8, (tb // 8) * 8)
        # v7x megacore: if the copy is big enough to care, make sure the grid
        # has at least 2 blocks so both TensorCores get work.
        if total_bytes >= (1 << 20) and b >= 16:
            half = (b // 2 // 8) * 8
            if half >= 8:
                tb = min(tb, half)
        block_batch = int(tb)

    grid = (pl.cdiv(b, block_batch),)
    kernel = partial(_shift_right_kernel, start_token=decoder_start_token_id)

    return pl.pallas_call(
        kernel,
        out_shape=jax.ShapeDtypeStruct((b, s), labels.dtype),
        grid=grid,
        in_specs=[pl.BlockSpec((block_batch, s), lambda i: (i, 0))],
        out_specs=pl.BlockSpec((block_batch, s), lambda i: (i, 0)),
        compiler_params=pltpu.CompilerParams(
            dimension_semantics=("parallel",)),     # shards grid across TCs on v7x
        cost_estimate=pl.CostEstimate(
            flops=0, transcendentals=0,
            bytes_accessed=2 * b * s * itemsize),
    )(labels)


def _shift_right_jnp(labels, decoder_start_token_id):
    """Pure-jnp fallback (lets XLA fuse; no launch overhead)."""
    rolled = jnp.roll(labels, shift=1, axis=-1)
    return rolled.at[..., 0].set(
        jnp.asarray(decoder_start_token_id, dtype=labels.dtype))


# Below this many elements (~2 MiB of int32) the pallas_call launch overhead
# and custom-call fusion barrier dominate a pure-copy op; let XLA fuse it.
_PALLAS_MIN_ELEMENTS = 512 * 1024


def shift_right(labels, decoder_start_token_id, *, use_pallas=None):
    if use_pallas is None:
        s = labels.shape[-1]
        use_pallas = (labels.ndim == 2
                      and labels.size >= _PALLAS_MIN_ELEMENTS
                      and s % 128 == 0)       # lane-dense stores only
    if use_pallas:
        return shift_right_pallas(labels, decoder_start_token_id)
    return _shift_right_jnp(labels, decoder_start_token_id)


# ----------------------------------------------------------------------------
# Module-equivalent forward (field re-wiring is glue; shift is the kernel).
# ----------------------------------------------------------------------------
class T5LastEncoderLayerPipeline:
    def __init__(self, config):
        self.config = config

    def _shift_right(self, input_ids):
        assert self.config.decoder_start_token_id is not None
        assert self.config.pad_token_id is not None
        # NOTE: matches the reference module exactly — like the given PyTorch
        # code, it does NOT remap -100 ignore-index labels to pad_token_id
        # (the full HF T5 implementation does).
        return shift_right(input_ids, self.config.decoder_start_token_id)

    def forward(self, inputs):
        if not isinstance(inputs, InputData):
            inputs = InputData(*inputs)
        # Python-level size checks mirror .numel() branching in the PyTorch
        # module; this is a structural (trace-time) decision, not
        # data-dependent control flow — keep it outside jit or make it static.
        if (inputs.labels.size != 0
                and inputs.decoder_input_ids.size == 0
                and inputs.decoder_inputs_embeds.size == 0):
            inputs = inputs._replace(
                decoder_input_ids=self._shift_right(inputs.labels))
        empty_int = jnp.zeros((0,), dtype=jnp.int32)
        inputs = inputs._replace(
            input_ids=inputs.decoder_input_ids,
            attention_mask=inputs.decoder_attention_mask,
            inputs_embeds=inputs.decoder_inputs_embeds,
            encoder_hidden_states=inputs.hidden_states,
            encoder_attention_mask=inputs.attention_mask,
            head_mask=inputs.decoder_head_mask,
            use_cache=empty_int,
            return_dict=inputs.return_dict,
            hidden_states=empty_int,
        )
        return inputs


if __name__ == "__main__":
    key = jax.random.PRNGKey(0)
    k1, k2, k3, k4 = jax.random.split(key, 4)

    def _ref_shift(x, start):
        return jnp.concatenate(
            [jnp.full(x.shape[:-1] + (1,), start, dtype=x.dtype),
             x[..., :-1]], axis=-1)

    # ---- Direct Pallas kernel check at a lane-dense shape (S multiple of 128).
    Bk, Sk = 16, 256
    labels_big = jax.random.randint(k3, (Bk, Sk), minval=1, maxval=100,
                                    dtype=jnp.int32)
    out_big = shift_right_pallas(labels_big, Config.decoder_start_token_id)
    jax.block_until_ready(out_big)
    assert jnp.array_equal(out_big,
                           _ref_shift(labels_big, Config.decoder_start_token_id)), \
        "pallas shift_right mismatch"

    # ---- Partial last batch block (b not a multiple of block_batch):
    #      relies on Pallas dropping out-of-bounds writes on the final block.
    Bp, Sp = 20, 256
    labels_part = jax.random.randint(k4, (Bp, Sp), minval=1, maxval=100,
                                     dtype=jnp.int32)
    out_part = shift_right_pallas(labels_part, Config.decoder_start_token_id,
                                  block_batch=8)          # grid = 3, last partial
    jax.block_until_ready(out_part)
    assert jnp.array_equal(out_part,
                           _ref_shift(labels_part, Config.decoder_start_token_id)), \
        "pallas shift_right (partial block) mismatch"

    # ---- Module-level forward at small demo shapes (uses jnp fallback path).
    B, S, H = 2, 8, 32  # batch, seq, hidden
    labels = jax.random.randint(k1, (B, S), minval=1, maxval=100,
                                dtype=jnp.int32)
    hidden_states = jax.random.normal(k2, (B, S, H), dtype=jnp.float32)
    attention_mask = jnp.ones((B, S), dtype=jnp.int32)
    decoder_attention_mask = jnp.ones((B, S), dtype=jnp.int32)

    empty_i = jnp.zeros((0,), dtype=jnp.int32)
    empty_f = jnp.zeros((0,), dtype=jnp.float32)

    inputs = InputData(
        input_ids=empty_i,
        labels=labels,
        attention_mask=attention_mask,
        encoder_hidden_states=empty_f,
        encoder_attention_mask=empty_i,
        inputs_embeds=empty_f,
        head_mask=empty_f,
        cross_attn_head_mask=empty_f,
        past_key_values=empty_f,
        use_cache=jnp.ones((1,), dtype=jnp.int32),
        output_attentions=empty_i,
        output_hidden_states=empty_i,
        return_dict=jnp.ones((1,), dtype=jnp.int32),
        hidden_states=hidden_states,
        encoder_extended_attention_mask=empty_f,
        position_bias=empty_f,
        encoder_decoder_position_bias=empty_f,
        decoder_input_ids=empty_i,            # empty -> forces _shift_right path
        decoder_inputs_embeds=empty_f,        # empty -> forces _shift_right path
        lm_logits=empty_f,
        loss=empty_f,
        extended_attention_mask=empty_f,
        decoder_attention_mask=decoder_attention_mask,
        decoder_head_mask=empty_f,
        input_shape=jnp.array([B, S], dtype=jnp.int32),
    )

    module = T5LastEncoderLayerPipeline(Config())
    out = module.forward(inputs)
    jax.tree_util.tree_map(jax.block_until_ready, tuple(out))

    ref_small = _ref_shift(labels, Config.decoder_start_token_id)
    assert jnp.array_equal(out.decoder_input_ids, ref_small), "shift mismatch"
    assert jnp.array_equal(out.input_ids, ref_small)
    assert jnp.array_equal(out.encoder_hidden_states, hidden_states)
    assert jnp.array_equal(out.encoder_attention_mask, attention_mask)
    assert jnp.array_equal(out.attention_mask, decoder_attention_mask)
    assert out.use_cache.size == 0 and out.hidden_states.size == 0

    print("KERNEL_OK")
</pallas_src>

<mosaic_0001>
module attributes {stable_mosaic.version = 11 : i64} {
  func.func @_shift_right_kernel(%arg0: i32, %arg1: memref<16x256xi32, #tpu.memory_space<vmem>>, %arg2: memref<16x256xi32, #tpu.memory_space<vmem>>) attributes {dimension_semantics = [#tpu.dimension_semantics<parallel>], iteration_bounds = array<i64: 1>, scalar_prefetch = 0 : i64, scratch_operands = 0 : i64, tpu.core_type = #tpu.core_type<tc>, window_params = [{transform_indices = @transform_0, window_bounds = array<i64: 16, 256>}, {transform_indices = @transform_1, window_bounds = array<i64: 16, 256>}]} {
    %c0 = arith.constant 0 : index
    %c0_0 = arith.constant 0 : index
    %0 = vector.load %arg1[%c0, %c0_0] : memref<16x256xi32, #tpu.memory_space<vmem>>, vector<16x256xi32>
    %c1_i32 = arith.constant 1 : i32
    %1 = tpu.dynamic_rotate %0 by %c1_i32 dim 1 : vector<16x256xi32>, i32 -> vector<16x256xi32>
    %2 = tpu.iota {dimensions = array<i32: 1>} : vector<16x256xi32>
    %c0_i32 = arith.constant 0 : i32
    %3 = vector.broadcast %c0_i32 : i32 to vector<16x256xi32>
    %4 = arith.cmpi eq, %2, %3 : vector<16x256xi32>
    %c0_i32_1 = arith.constant 0 : i32
    %5 = vector.broadcast %c0_i32_1 : i32 to vector<16x256xi32>
    %6 = arith.select %4, %5, %1 : vector<16x256xi1>, vector<16x256xi32>
    %c0_2 = arith.constant 0 : index
    %c0_3 = arith.constant 0 : index
    %7 = vector.load %arg2[%c0_2, %c0_3] : memref<16x256xi32, #tpu.memory_space<vmem>>, vector<16x256xi32>
    tpu.vector_store %arg2[%c0_2, %c0_3], %6 {strides = array<i32>} : memref<16x256xi32, #tpu.memory_space<vmem>>, vector<16x256xi32>,
    return
  }
  func.func @transform_0(%arg0: i32) -> (i32, i32) {
    %c0_i32 = arith.constant 0 : i32
    %c0_i32_0 = arith.constant 0 : i32
    return %arg0, %c0_i32 : i32, i32
  }
  func.func @transform_1(%arg0: i32) -> (i32, i32) {
    %c0_i32 = arith.constant 0 : i32
    %c0_i32_0 = arith.constant 0 : i32
    return %arg0, %c0_i32 : i32, i32
  }
}

</mosaic_0001>

<bundles_post_ra>
// kernel: tpu_custom_call.1
= control target key start
LH: loop header
LB: loop body
LE: loop exit
PB: predicated region body
PF: predicated region fallthrough
CT: control target
= control target key end

     0   :  { %6 = vsyncpa [#allocation3], 0  ;;  %s160_s0 = inlined_call_operand.hbm [shape: s32[16,256], index: 0, kind: input, shape index: {}]   ;;  %s161_s1 = inlined_call_operand.hbm [shape: s32[16,256], index: 1, kind: output, shape index: {}]  }
   0x1   :  { %7 = vsyncpa [#allocation4], 0  ;;  %s12_s8 = sshll.u32 %s160_s0, 4  ;;  %s131_s9 = smov [#allocation2]   ;;  %s13_s8 = int_to_ptr.hbm [resolvable:$true] %s12_s8 }
   0x2   :  { %s14_s10 = sshll.u32 %s131_s9, 4  ;;  %s132_s11 = smov 256   ;;  %s15_s10 = int_to_ptr.vmem [resolvable:$true] %s14_s10 }
   0x3   :  { %s133_s12 = smov 16  }
   0x4   :  { %20 = dma.hbm_to_vmem [thread:$0]  %s13_s8, 512, %s15_s10, [#allocation3], %s132_s11, %s132_s11, %s133_s12  }
   0x5   :  { %127 = dma.done.wait [#allocation3], 512  }
   0x6   :  { %128 = vsyncadd [#allocation3], 4294966784  ;;  %v26_v0 = vld [vmem:[#allocation2 + $0x8] sm:$0xff]  ;;  %v25_v1 = vld [vmem:[#allocation2] sm:$0xff]  ;;  %s134_s13 = smov 1   ;;  %v37_v4 = vlaneseq  ;;  %s135_s0 = smov [#allocation5]  }
   0x7   :  { %33 = vrot.lane.b32.xlu1 %v26_v0, %s134_s13  ;;  %29 = vrot.lane.b32.xlu0 %v25_v1, %s134_s13  ;;  %v28_v2 = vld [vmem:[#allocation2 + $0x18] sm:$0xff]  ;;  %v27_v3 = vld [vmem:[#allocation2 + $0x10] sm:$0xff]  ;;  %s59_s14 = sshll.u32 %s135_s0, 4  ;;  %s61_s17 = sshll.u32 %s161_s1, 4  ;;  %s60_s14 = int_to_ptr.vmem [resolvable:$true] %s59_s14  ;;  %s62_s17 = int_to_ptr.hbm [resolvable:$true] %s61_s17 }
   0x8   :  { %v38_v5 = vand.u32 127, %v37_v4 }
   0xa   :  { %vm39_vm0 = vcmp.lt.s32.totalorder %v38_v5, 1  ;;  %vm45_vm1 = vcmp.eq.s32.totalorder %v38_v5, 0 }
   0xf   :  { %35 = vrot.lane.b32.xlu1 %v28_v2, %s134_s13  ;;  %31 = vrot.lane.b32.xlu0 %v27_v3, %s134_s13 }
  0x79   :  { %v34_v6 = vpop.permute.xlu1 %33  ;;  %v30_v7 = vpop.permute.xlu0 %29 }
  0x7a   :  { %v40_v8 = vsel %vm39_vm0, %v30_v7, %v34_v6  ;;  %v42_v9 = vsel %vm39_vm0, %v34_v6, %v30_v7 }
  0x7b   :  { %v47_v10 = vsel %vm45_vm1, 0, %v42_v9  ;;  %52 = vst [vmem:[#allocation5 + $0x8] sm:$0xff] %v40_v8 }
  0x7c   :  { %51 = vst [vmem:[#allocation5] sm:$0xff] %v47_v10 }
  0x81   :  { %v36_v11 = vpop.permute.xlu1 %35  ;;  %v32_v12 = vpop.permute.xlu0 %31 }
  0x82   :  { %v41_v13 = vsel %vm39_vm0, %v32_v12, %v36_v11  ;;  %v43_v14 = vsel %vm39_vm0, %v36_v11, %v32_v12 }
  0x83   :  { %v49_v15 = vsel %vm45_vm1, 0, %v43_v14  ;;  %54 = vst [vmem:[#allocation5 + $0x18] sm:$0xff] %v41_v13 }
  0x84   :  { %53 = vst [vmem:[#allocation5 + $0x10] sm:$0xff] %v49_v15 }
  0x85   :  { %67 = dma.vmem_to_hbm [thread:$0]  %s60_s14, 512, %s62_s17, [#allocation4], %s132_s11, %s132_s11, %s133_s12  }
  0x86   :  { %129 = dma.done.wait [#allocation4], 512  }
  0x87   :  { %130 = vsyncadd [#allocation4], 4294966784 }
  0x88   :  { %72 = vsyncpa [#allocation3], 1 }
  0x89   :  { %73 = vsyncpa [#allocation4], 1 }

</bundles_post_ra>
